<compile_context>
chip_gen: v5e
topology: v5e:2x2
jax: 0.10.0
libtpu: 0.0.40
codegen_flags: <defaults>
</compile_context>

<pallas_src>
import functools

import jax
import jax.numpy as jnp
from jax.experimental import pallas as pl
from jax.experimental.pallas import tpu as pltpu

LANE = 128


def _round_up(x, m):
    return ((x + m - 1) // m) * m


def _largest_tile(n_pad, cap):
    """Largest multiple of LANE that divides n_pad and is <= cap (>= LANE)."""
    best, t = LANE, LANE
    while t <= min(cap, n_pad):
        if n_pad % t == 0:
            best = t
        t += LANE
    return best


def _vmem_capacity_bytes():
    try:
        return int(pltpu.get_tpu_info().vmem_capacity_bytes)
    except Exception:
        return 64 * 1024 * 1024  # conservative fallback (v7x per-TC VMEM)


# -----------------------------------------------------------------------------
# Layer 1 kernel: out = relu(A_hat[row_blk] @ XW1 + b1) @ W2      (bf16 out)
# grid = (row_blocks, k_blocks); k is the aggregation reduction axis.
# -----------------------------------------------------------------------------
def _layer1_kernel(a_ref, xw1_ref, w2_ref, b1_ref, o_ref, acc_ref):
    k = pl.program_id(1)

    @pl.when(k == 0)
    def _():
        acc_ref[...] = jnp.zeros_like(acc_ref)

    acc_ref[...] += jnp.dot(a_ref[...], xw1_ref[...],
                            preferred_element_type=jnp.float32)

    @pl.when(k == pl.num_programs(1) - 1)
    def _():
        h1 = jnp.maximum(acc_ref[...] + b1_ref[...], 0.0)
        # TODO(synk): training-mode F.dropout (pltpu PRNG + mask) omitted; it is
        # the identity in eval mode, which is what this implements.
        o_ref[...] = jnp.dot(
            h1.astype(w2_ref.dtype), w2_ref[...],
            preferred_element_type=jnp.float32).astype(o_ref.dtype)


# -----------------------------------------------------------------------------
# Layer 2 kernel: out = log_softmax(A_hat[row_blk] @ Y2 + b2)      (f32 out)
# -----------------------------------------------------------------------------
def _layer2_kernel(a_ref, y2_ref, b2_ref, o_ref, acc_ref, *, num_classes):
    k = pl.program_id(1)

    @pl.when(k == 0)
    def _():
        acc_ref[...] = jnp.zeros_like(acc_ref)

    acc_ref[...] += jnp.dot(a_ref[...], y2_ref[...],
                            preferred_element_type=jnp.float32)

    @pl.when(k == pl.num_programs(1) - 1)
    def _():
        z = acc_ref[...] + b2_ref[...]
        lane = jax.lax.broadcasted_iota(jnp.int32, z.shape, 1)
        z = jnp.where(lane < num_classes, z, -1e30)  # mask padded class lanes
        m = jnp.max(z, axis=-1, keepdims=True)
        s = z - m
        lse = jnp.log(jnp.sum(jnp.exp(s), axis=-1, keepdims=True))
        o_ref[...] = (s - lse).astype(o_ref.dtype)


# -----------------------------------------------------------------------------
# Glue: symmetric-normalized adjacency  A_hat = D^{-1/2} (A + I_remaining) D^{-1/2}
# -----------------------------------------------------------------------------
def gcn_normalized_adjacency(edge_index, edge_weight, num_nodes):
    src = edge_index[0]
    dst = edge_index[1]
    if edge_weight is None:
        edge_weight = jnp.ones((edge_index.shape[1],), dtype=jnp.float32)
    # dense A with A[dst, src] = w  (messages from src aggregated into dst)
    a = jnp.zeros((num_nodes, num_nodes), jnp.float32).at[dst, src].add(edge_weight)
    # add_remaining_self_loops: unit self-loop only for nodes with no (i, i)
    # entry in edge_index (detected structurally, not from the weight value).
    has_self = jnp.zeros((num_nodes,), jnp.int32).at[src].add(
        (src == dst).astype(jnp.int32)) > 0
    a = a + jnp.diag(jnp.where(has_self, 0.0, 1.0))
    deg = jnp.sum(a, axis=1)
    d_inv_sqrt = jnp.where(deg > 0, 1.0 / jnp.sqrt(deg), 0.0)
    return d_inv_sqrt[:, None] * a * d_inv_sqrt[None, :]


# -----------------------------------------------------------------------------
# One row-parallel aggregation pallas_call (shared by both layers)
# -----------------------------------------------------------------------------
def _aggregate_call(a_pad, y, extra_inputs, extra_specs, kernel, out_dtype,
                    tm, tk, cost, vmem_limit):
    n_pad = a_pad.shape[0]
    wp = y.shape[1]
    nr = n_pad // tm
    nk = n_pad // tk
    return pl.pallas_call(
        kernel,
        out_shape=jax.ShapeDtypeStruct((n_pad, wp), out_dtype),
        grid_spec=pltpu.PrefetchScalarGridSpec(
            num_scalar_prefetch=0,
            grid=(nr, nk),
            in_specs=[
                pl.BlockSpec((tm, tk), lambda i, k: (i, k)),   # A_hat row tile
                pl.BlockSpec((tk, wp), lambda i, k: (k, 0)),   # feature transform
            ] + extra_specs,
            out_specs=pl.BlockSpec((tm, wp), lambda i, k: (i, 0)),
            scratch_shapes=[pltpu.VMEM((tm, wp), jnp.float32)],  # per-block acc
        ),
        compiler_params=pltpu.CompilerParams(
            dimension_semantics=("parallel", "arbitrary"),
            vmem_limit_bytes=vmem_limit,
        ),
        cost_estimate=cost,
    )(a_pad, y, *extra_inputs)


# -----------------------------------------------------------------------------
# GCNNet forward
# -----------------------------------------------------------------------------
def gcn_net_forward(x, edge_index, edge_weight, params):
    n, f = x.shape
    h = params["w1"].shape[1]
    c = params["w2"].shape[1]

    a_hat = gcn_normalized_adjacency(edge_index, edge_weight, n)

    # Lane-dense zero padding: feature / hidden / class dims -> multiples of 128.
    fp = _round_up(f, LANE)
    wp = _round_up(max(h, c), LANE)          # shared padded width (hidden & classes)
    n_pad = _round_up(n, LANE)

    # bf16 operands; all accumulation inside the kernels stays f32.
    a_pad = jnp.zeros((n_pad, n_pad), jnp.bfloat16).at[:n, :n].set(
        a_hat.astype(jnp.bfloat16))
    x_pad = jnp.zeros((n_pad, fp), jnp.bfloat16).at[:n, :f].set(
        x.astype(jnp.bfloat16))
    w1_pad = jnp.zeros((fp, wp), jnp.bfloat16).at[:f, :h].set(
        params["w1"].astype(jnp.bfloat16))
    w2_pad = jnp.zeros((wp, wp), jnp.bfloat16).at[:h, :c].set(
        params["w2"].astype(jnp.bfloat16))
    b1_pad = jnp.zeros((1, wp), jnp.float32).at[0, :h].set(params["b1"])
    b2_pad = jnp.zeros((1, wp), jnp.float32).at[0, :c].set(params["b2"])

    # Hoisted feature transform: tiny (n, f) x (f, h) matmul done once here, so
    # X / W1 never occupy VMEM inside the bandwidth-bound aggregation kernels.
    xw1 = jnp.dot(x_pad, w1_pad,
                  preferred_element_type=jnp.float32).astype(jnp.bfloat16)

    # ---- generation-aware tiling --------------------------------------------
    vmem_cap = _vmem_capacity_bytes()
    tm = _largest_tile(n_pad, 256)      # output row block
    tk = _largest_tile(n_pad, 2048)     # reduction block (contiguous A DMA rows)

    def vmem_est(tm_, tk_):
        return (2 * tm_ * tk_ * 2            # A tiles, double-buffered (bf16)
                + 2 * tk_ * wp * 2           # transform tiles (bf16)
                + 2 * (wp * wp * 2 + 2 * wp * 4)   # W2 + biases
                + 2 * tm_ * wp * 4           # output block (f32 worst case)
                + tm_ * wp * 4)              # f32 accumulator scratch

    while tk > LANE and vmem_est(tm, tk) > 0.6 * vmem_cap:
        tk = _largest_tile(n_pad, tk - LANE)
    while tm > LANE and vmem_est(tm, tk) > 0.6 * vmem_cap:
        tm = _largest_tile(n_pad, tm - LANE)

    vmem_limit = int(min(0.9 * vmem_cap,
                         max(4 * vmem_est(tm, tk), 16 * 1024 * 1024)))
    nr = n_pad // tm

    # ---- layer 1: Y2 = relu(A_hat @ XW1 + b1) @ W2  (bf16) -------------------
    cost1 = pl.CostEstimate(
        flops=int(2 * n_pad * n_pad * wp + 2 * n_pad * wp * wp),
        transcendentals=0,
        bytes_accessed=int(a_pad.size * 2 + nr * n_pad * wp * 2
                           + w2_pad.size * 2 + b1_pad.size * 4 + n_pad * wp * 2),
    )
    y2 = _aggregate_call(
        a_pad, xw1, [w2_pad, b1_pad],
        [pl.BlockSpec((wp, wp), lambda i, k: (0, 0)),
         pl.BlockSpec((1, wp), lambda i, k: (0, 0))],
        _layer1_kernel, jnp.bfloat16, tm, tk, cost1, vmem_limit)

    # ---- layer 2: out = log_softmax(A_hat @ Y2 + b2)  (f32) ------------------
    cost2 = pl.CostEstimate(
        flops=int(2 * n_pad * n_pad * wp),
        transcendentals=int(n_pad * wp),
        bytes_accessed=int(a_pad.size * 2 + nr * n_pad * wp * 2
                           + b2_pad.size * 4 + n_pad * wp * 4),
    )
    out_pad = _aggregate_call(
        a_pad, y2, [b2_pad],
        [pl.BlockSpec((1, wp), lambda i, k: (0, 0))],
        functools.partial(_layer2_kernel, num_classes=c),
        jnp.float32, tm, tk, cost2, vmem_limit)

    return out_pad[:n, :c]


# -----------------------------------------------------------------------------
# Pure-JAX reference mirroring the kernel's bf16 rounding (for correctness check)
# -----------------------------------------------------------------------------
def gcn_net_reference(x, edge_index, edge_weight, params):
    n = x.shape[0]
    bf = lambda t: t.astype(jnp.bfloat16).astype(jnp.float32)
    a = bf(gcn_normalized_adjacency(edge_index, edge_weight, n))
    xw1 = bf(bf(x) @ bf(params["w1"]))
    h1 = jnp.maximum(a @ xw1 + params["b1"], 0.0)
    y2 = bf(bf(h1) @ bf(params["w2"]))
    z = a @ y2 + params["b2"]
    return jax.nn.log_softmax(z, axis=1)


def glorot(key, shape):
    fan_in, fan_out = shape
    limit = jnp.sqrt(6.0 / (fan_in + fan_out))
    return jax.random.uniform(key, shape, jnp.float32, -limit, limit)


if __name__ == "__main__":
    # Small synthetic graph: N = 64 nodes, num_features = 32, hidden = 16, classes = 8
    N, F, H, C = 64, 32, 16, 8
    E = 256

    key = jax.random.PRNGKey(0)
    k_x, k_src, k_dst, k_w, k_w1, k_w2 = jax.random.split(key, 6)

    x = jax.random.normal(k_x, (N, F), jnp.float32)
    src = jax.random.randint(k_src, (E,), 0, N)
    dst = jax.random.randint(k_dst, (E,), 0, N)
    edge_index = jnp.stack([src, dst], axis=0)          # (2, E)
    edge_weight = jax.random.uniform(k_w, (E,), jnp.float32, 0.5, 1.5)

    params = {
        "w1": glorot(k_w1, (F, H)),
        "b1": jnp.zeros((H,), jnp.float32),
        "w2": glorot(k_w2, (H, C)),
        "b2": jnp.zeros((C,), jnp.float32),
    }

    out = gcn_net_forward(x, edge_index, edge_weight, params)
    out = jax.block_until_ready(out)

    # sanity: shape, probabilities per row sum to 1, matches reference
    assert out.shape == (N, C)
    row_sums = jnp.sum(jnp.exp(out), axis=1)
    assert jnp.allclose(row_sums, 1.0, atol=1e-4)

    ref = gcn_net_reference(x, edge_index, edge_weight, params)
    assert jnp.allclose(out, ref, atol=5e-2), float(jnp.max(jnp.abs(out - ref)))

    print("KERNEL_OK")
</pallas_src>

<mosaic_0001>
module attributes {stable_mosaic.version = 11 : i64} {
  func.func @_layer1_kernel(%arg0: i32, %arg1: i32, %arg2: memref<128x128xbf16, #tpu.memory_space<vmem>>, %arg3: memref<128x128xbf16, #tpu.memory_space<vmem>>, %arg4: memref<128x128xbf16, #tpu.memory_space<vmem>>, %arg5: memref<1x128xf32, #tpu.memory_space<vmem>>, %arg6: memref<128x128xbf16, #tpu.memory_space<vmem>>, %arg7: memref<128x128xf32, #tpu.memory_space<vmem>>) attributes {dimension_semantics = [#tpu.dimension_semantics<parallel>, #tpu.dimension_semantics<arbitrary>], iteration_bounds = array<i64: 1, 1>, scalar_prefetch = 0 : i64, scratch_operands = 1 : i64, tpu.core_type = #tpu.core_type<tc>, window_params = [{transform_indices = @transform_0, window_bounds = array<i64: 128, 128>}, {transform_indices = @transform_1, window_bounds = array<i64: 128, 128>}, {pipeline_mode = #tpu.pipeline_mode<synchronous>, transform_indices = @transform_2, window_bounds = array<i64: 128, 128>}, {pipeline_mode = #tpu.pipeline_mode<synchronous>, transform_indices = @transform_3, window_bounds = array<i64: 1, 128>}, {transform_indices = @transform_4, window_bounds = array<i64: 128, 128>}]} {
    %c0_i32 = arith.constant 0 : i32
    %0 = arith.cmpi eq, %arg1, %c0_i32 : i32
    %1 = arith.extui %0 : i1 to i32
    %c0_i32_0 = arith.constant 0 : i32
    %2 = arith.cmpi ne, %1, %c0_i32_0 : i32
    scf.if %2 {
      %cst_10 = arith.constant 0.000000e+00 : f32
      %12 = vector.broadcast %cst_10 : f32 to vector<128x128xf32>
      %c0_11 = arith.constant 0 : index
      %c0_12 = arith.constant 0 : index
      %13 = vector.load %arg7[%c0_11, %c0_12] : memref<128x128xf32, #tpu.memory_space<vmem>>, vector<128x128xf32>
      tpu.vector_store %arg7[%c0_11, %c0_12], %12 {strides = array<i32>} : memref<128x128xf32, #tpu.memory_space<vmem>>, vector<128x128xf32>,
    } else {
    }
    %c0 = arith.constant 0 : index
    %c0_1 = arith.constant 0 : index
    %3 = vector.load %arg7[%c0, %c0_1] : memref<128x128xf32, #tpu.memory_space<vmem>>, vector<128x128xf32>
    %c0_2 = arith.constant 0 : index
    %c0_3 = arith.constant 0 : index
    %4 = vector.load %arg2[%c0_2, %c0_3] : memref<128x128xbf16, #tpu.memory_space<vmem>>, vector<128x128xbf16>
    %c0_4 = arith.constant 0 : index
    %c0_5 = arith.constant 0 : index
    %5 = vector.load %arg3[%c0_4, %c0_5] : memref<128x128xbf16, #tpu.memory_space<vmem>>, vector<128x128xbf16>
    %cst = arith.constant dense<0.000000e+00> : vector<128x128xf32>
    %6 = tpu.matmul %4, %5, %cst {dimension_numbers = #tpu.dot_dimension_numbers<[1], [0], [0], [1], [0, 0, 1, 1], [], []>} : vector<128x128xbf16>, vector<128x128xbf16>, vector<128x128xf32> -> vector<128x128xf32>
    %7 = arith.addf %3, %6 : vector<128x128xf32>
    %c0_6 = arith.constant 0 : index
    %c0_7 = arith.constant 0 : index
    %8 = vector.load %arg7[%c0_6, %c0_7] : memref<128x128xf32, #tpu.memory_space<vmem>>, vector<128x128xf32>
    tpu.vector_store %arg7[%c0_6, %c0_7], %7 {strides = array<i32>} : memref<128x128xf32, #tpu.memory_space<vmem>>, vector<128x128xf32>,
    %c0_i32_8 = arith.constant 0 : i32
    %9 = arith.cmpi eq, %arg1, %c0_i32_8 : i32
    %10 = arith.extui %9 : i1 to i32
    %c0_i32_9 = arith.constant 0 : i32
    %11 = arith.cmpi ne, %10, %c0_i32_9 : i32
    scf.if %11 {
      %c0_10 = arith.constant 0 : index
      %c0_11 = arith.constant 0 : index
      %12 = vector.load %arg7[%c0_10, %c0_11] : memref<128x128xf32, #tpu.memory_space<vmem>>, vector<128x128xf32>
      %c0_12 = arith.constant 0 : index
      %c0_13 = arith.constant 0 : index
      %13 = vector.load %arg5[%c0_12, %c0_13] : memref<1x128xf32, #tpu.memory_space<vmem>>, vector<1x128xf32>
      %14 = vector.broadcast %13 : vector<1x128xf32> to vector<128x128xf32>
      %15 = arith.addf %12, %14 : vector<128x128xf32>
      %cst_14 = arith.constant 0.000000e+00 : f32
      %16 = vector.broadcast %cst_14 : f32 to vector<128x128xf32>
      %17 = arith.maximumf %15, %16 : vector<128x128xf32>
      %18 = arith.truncf %17 : vector<128x128xf32> to vector<128x128xbf16>
      %c0_15 = arith.constant 0 : index
      %c0_16 = arith.constant 0 : index
      %19 = vector.load %arg4[%c0_15, %c0_16] : memref<128x128xbf16, #tpu.memory_space<vmem>>, vector<128x128xbf16>
      %cst_17 = arith.constant dense<0.000000e+00> : vector<128x128xf32>
      %20 = tpu.matmul %18, %19, %cst_17 {dimension_numbers = #tpu.dot_dimension_numbers<[1], [0], [0], [1], [0, 0, 1, 1], [], []>} : vector<128x128xbf16>, vector<128x128xbf16>, vector<128x128xf32> -> vector<128x128xf32>
      %21 = arith.truncf %20 : vector<128x128xf32> to vector<128x128xbf16>
      %c0_18 = arith.constant 0 : index
      %c0_19 = arith.constant 0 : index
      %22 = vector.load %arg6[%c0_18, %c0_19] : memref<128x128xbf16, #tpu.memory_space<vmem>>, vector<128x128xbf16>
      tpu.vector_store %arg6[%c0_18, %c0_19], %21 {strides = array<i32>} : memref<128x128xbf16, #tpu.memory_space<vmem>>, vector<128x128xbf16>,
    } else {
    }
    return
  }
  func.func @transform_0(%arg0: i32, %arg1: i32) -> (i32, i32) {
    %c0_i32 = arith.constant 0 : i32
    return %arg0, %arg1 : i32, i32
  }
  func.func @transform_1(%arg0: i32, %arg1: i32) -> (i32, i32) {
    %c0_i32 = arith.constant 0 : i32
    %c0_i32_0 = arith.constant 0 : i32
    return %arg1, %c0_i32 : i32, i32
  }
  func.func @transform_2(%arg0: i32, %arg1: i32) -> (i32, i32) {
    %c0_i32 = arith.constant 0 : i32
    %c0_i32_0 = arith.constant 0 : i32
    %c0_i32_1 = arith.constant 0 : i32
    return %c0_i32, %c0_i32_0 : i32, i32
  }
  func.func @transform_3(%arg0: i32, %arg1: i32) -> (i32, i32) {
    %c0_i32 = arith.constant 0 : i32
    %c0_i32_0 = arith.constant 0 : i32
    %c0_i32_1 = arith.constant 0 : i32
    return %c0_i32, %c0_i32_0 : i32, i32
  }
  func.func @transform_4(%arg0: i32, %arg1: i32) -> (i32, i32) {
    %c0_i32 = arith.constant 0 : i32
    %c0_i32_0 = arith.constant 0 : i32
    return %arg0, %c0_i32 : i32, i32
  }
}

</mosaic_0001>

<bundles_post_ra>
// kernel: tpu_custom_call.1
= control target key start
LH: loop header
LB: loop body
LE: loop exit
PB: predicated region body
PF: predicated region fallthrough
CT: control target
= control target key end

     0   :  { %9 = vsyncpa [#allocation4], 0  ;;  %s888_s0 = inlined_call_operand.hbm [shape: bf16[128,128], index: 0, kind: input, shape index: {}]   ;;  %s889_s1 = inlined_call_operand.hbm [shape: bf16[128,128], index: 1, kind: input, shape index: {}]   ;;  %s890_s2 = inlined_call_operand.hbm [shape: bf16[128,128], index: 2, kind: input, shape index: {}]   ;;  %s891_s3 = inlined_call_operand.vmem [shape: f32[1,128], index: 3, kind: input, shape index: {}]   ;;  %s892_s4 = inlined_call_operand.hbm [shape: bf16[128,128], index: 4, kind: output, shape index: {}]  }
   0x1   :  { %10 = vsyncpa [#allocation7], 0 }
   0x2   :  { %11 = vsyncpa [#allocation5], 0  ;;  %s29_s17 = sshll.u32 %s889_s1, 4  ;;  %s830_s18 = smov [#allocation6]   ;;  %s30_s17 = int_to_ptr.hbm [resolvable:$true] %s29_s17 }
   0x3   :  { %s31_s19 = sshll.u32 %s830_s18, 4  ;;  %s16_s22 = sshll.u32 %s888_s0, 4  ;;  %s32_s19 = int_to_ptr.vmem [resolvable:$true] %s31_s19  ;;  %s17_s22 = int_to_ptr.hbm [resolvable:$true] %s16_s22 }
   0x4   :  { %s831_s23 = smov 64   ;;  %s832_s24 = smov 4  }
   0x5   :  { %37 = dma.hbm_to_vmem [thread:$0]  %s30_s17, 1024, %s32_s19, [#allocation7], %s831_s23, %s831_s23, %s832_s24  }
   0x6   :  { %s833_s25 = smov [#allocation3]   ;;  %s42_s1 = sshll.u32 %s890_s2, 4  ;;  %s43_s1 = int_to_ptr.hbm [resolvable:$true] %s42_s1 }
   0x7   :  { %s18_s26 = sshll.u32 %s833_s25, 4  ;;  %s834_s0 = smov [#allocation8]   ;;  %s19_s26 = int_to_ptr.vmem [resolvable:$true] %s18_s26 }
   0x8   :  { %24 = dma.hbm_to_vmem [thread:$0]  %s17_s22, 1024, %s19_s26, [#allocation4], %s831_s23, %s831_s23, %s832_s24  }
   0x9   :  { %s44_s29 = sshll.u32 %s834_s0, 4  ;;  %s45_s29 = int_to_ptr.vmem [resolvable:$true] %s44_s29 }
   0xa   :  { %50 = dma.hbm_to_vmem [thread:$0]  %s43_s1, 1024, %s45_s29, [#allocation7], %s831_s23, %s831_s23, %s832_s24  }
   0xb   :  { %824 = dma.done.wait [#allocation4], 1024  }
   0xc   :  { %825 = vsyncadd [#allocation4], 4294966272 }
   0xd   :  { %826 = dma.done.wait [#allocation7], 2048  }
   0xe   :  { %827 = vsyncadd [#allocation7], 4294965248  ;;  %v649_v0 = vld [vmem:[#allocation6 + $0x38] sm:$0xff]  ;;  %v648_v1 = vld [vmem:[#allocation6 + $0x30] sm:$0xff]  ;;  %s524_s8 = sshll.u32 %s892_s4, 4  ;;  %s525_s8 = int_to_ptr.hbm [resolvable:$true] %s524_s8 }
   0xf   :  { %229 = vmatpush.bf16.msra.mxu0 %v649_v0  ;;  %705 = vmatpush.bf16.msra.mxu2 %v649_v0  ;;  %v647_v2 = vld [vmem:[#allocation6 + $0x28] sm:$0xff]  ;;  %v646_v3 = vld [vmem:[#allocation6 + $0x20] sm:$0xff]  ;;  %v645_v4 = vld [vmem:[#allocation6 + $0x18] sm:$0xff] }
  0x10   :  { %v644_v5 = vld [vmem:[#allocation6 + $0x10] sm:$0xff]  ;;  %v643_v6 = vld [vmem:[#allocation6 + $0x8] sm:$0xff]  ;;  %v642_v7 = vld [vmem:[#allocation6] sm:$0xff] }
  0x11   :  { %v634_v8 = vld [vmem:[#allocation3] sm:$0xff]  ;;  %v635_v10 = vld [vmem:[#allocation3 + $0x8] sm:$0xff]  ;;  %v657_v12 = vld [vmem:[#allocation8 + $0x38] sm:$0xff] }
  0x12   :  { %v638_v9 = vld [vmem:[#allocation3 + $0x20] sm:$0xff]  ;;  %v639_v11 = vld [vmem:[#allocation3 + $0x28] sm:$0xff]  ;;  %437 = vmatpush.bf16.msra.mxu1 %v657_v12  ;;  %v656_v13 = vld [vmem:[#allocation8 + $0x30] sm:$0xff]  ;;  %713 = vmatpush.bf16.msra.mxu3 %v657_v12 }
  0x13   :  { %230 = vmatpush.bf16.msra.mxu0 %v648_v1  ;;  %706 = vmatpush.bf16.msra.mxu2 %v648_v1  ;;  %v655_v14 = vld [vmem:[#allocation8 + $0x28] sm:$0xff]  ;;  %v654_v15 = vld [vmem:[#allocation8 + $0x20] sm:$0xff]  ;;  %v636_v16 = vld [vmem:[#allocation3 + $0x10] sm:$0xff] }
  0x14   :  { %v640_v17 = vld [vmem:[#allocation3 + $0x30] sm:$0xff]  ;;  %v637_v18 = vld [vmem:[#allocation3 + $0x18] sm:$0xff]  ;;  %v651_v22 = vld [vmem:[#allocation8 + $0x8] sm:$0xff] }
  0x15   :  { %v641_v19 = vld [vmem:[#allocation3 + $0x38] sm:$0xff]  ;;  %v652_v21 = vld [vmem:[#allocation8 + $0x10] sm:$0xff]  ;;  %v650_v23 = vld [vmem:[#allocation8] sm:$0xff] }
  0x16   :  { %438 = vmatpush.bf16.msra.mxu1 %v656_v13  ;;  %714 = vmatpush.bf16.msra.mxu3 %v656_v13  ;;  %v653_v20 = vld [vmem:[#allocation8 + $0x18] sm:$0xff]  ;;  %v727_v25 = vld [vmem:[%s891_s3] ss:$0 sm:$0xff]  ;;  %s835_s3 = smov [#allocation9]  }
  0x17   :  { %231 = vmatpush.bf16.msra.mxu0 %v647_v2  ;;  %707 = vmatpush.bf16.msra.mxu2 %v647_v2  ;;  %s522_s5 = sshll.u32 %s835_s3, 4  ;;  %s523_s5 = int_to_ptr.vmem [resolvable:$true] %s522_s5 }
  0x1a   :  { %439 = vmatpush.bf16.msra.mxu1 %v655_v14  ;;  %715 = vmatpush.bf16.msra.mxu3 %v655_v14 }
  0x1b   :  { %232 = vmatpush.bf16.msra.mxu0 %v646_v3  ;;  %708 = vmatpush.bf16.msra.mxu2 %v646_v3 }
  0x1e   :  { %440 = vmatpush.bf16.msra.mxu1 %v654_v15  ;;  %716 = vmatpush.bf16.msra.mxu3 %v654_v15 }
  0x1f   :  { %233 = vmatpush.bf16.msra.mxu0 %v645_v4  ;;  %709 = vmatpush.bf16.msra.mxu2 %v645_v4 }
  0x22   :  { %441 = vmatpush.bf16.msra.mxu1 %v653_v20  ;;  %717 = vmatpush.bf16.msra.mxu3 %v653_v20 }
  0x23   :  { %234 = vmatpush.bf16.msra.mxu0 %v644_v5  ;;  %710 = vmatpush.bf16.msra.mxu2 %v644_v5 }
  0x26   :  { %442 = vmatpush.bf16.msra.mxu1 %v652_v21  ;;  %718 = vmatpush.bf16.msra.mxu3 %v652_v21 }
  0x27   :  { %235 = vmatpush.bf16.msra.mxu0 %v643_v6  ;;  %711 = vmatpush.bf16.msra.mxu2 %v643_v6 }
  0x2a   :  { %443 = vmatpush.bf16.msra.mxu1 %v651_v22  ;;  %719 = vmatpush.bf16.msra.mxu3 %v651_v22 }
  0x2b   :  { %236 = vmatpush.bf16.msra.mxu0 %v642_v7  ;;  %712 = vmatpush.bf16.msra.mxu2 %v642_v7 }
  0x2e   :  { %237 = vmatmul.bf16.vlgmr.msra.gmra.mxu0 %v634_v8  ;;  %257 = vmatmul.bf16.vlgmr.msra.gmra.mxu2 %v638_v9 }
  0x2f   :  { %444 = vmatpush.bf16.msra.mxu1 %v650_v23  ;;  %720 = vmatpush.bf16.msra.mxu3 %v650_v23 }
  0x3e   :  { %242 = vmatmul.bf16.gmra.mxu0 %v635_v10  ;;  %262 = vmatmul.bf16.gmra.mxu2 %v639_v11 }
  0x4e   :  { %247 = vmatmul.bf16.gmra.mxu0 %v636_v16  ;;  %267 = vmatmul.bf16.gmra.mxu2 %v640_v17 }
  0x5e   :  { %252 = vmatmul.bf16.gmra.mxu0 %v637_v18  ;;  %272 = vmatmul.bf16.gmra.mxu2 %v641_v19 }
  0xab   :  { %v238_v24 = vpop.f32.mrf.mxu0 }
  0xac   :  { %v333_v26 = vadd.f32 %v727_v25, %v238_v24 }
  0xae   :  { %v349_v29 = vmax.f32 %v333_v26, 0.0 }
  0xb1   :  { %v258_v27 = vpop.f32.mrf.mxu2 }
  0xb2   :  { %v341_v32 = vadd.f32 %v727_v25, %v258_v27 }
  0xb3   :  { %v240_v28 = vpop.f32.mrf.mxu0 }
  0xb4   :  { %v334_v30 = vadd.f32 %v727_v25, %v240_v28  ;;  %v357_v37 = vmax.f32 %v341_v32, 0.0 }
  0xb6   :  { %v350_v31 = vmax.f32 %v334_v30, 0.0 }
  0xb8   :  { %v365_v33 = vpack.c.bf16 %v350_v31, %v349_v29 }
  0xb9   :  { %v260_v34 = vpop.f32.mrf.mxu2 }
  0xba   :  { %v342_v35 = vadd.f32 %v727_v25, %v260_v34  ;;  %445 = vmatmul.bf16.vlgmr.msra.gmra.mxu1 %v365_v33 }
  0xbb   :  { %v243_v36 = vpop.f32.mrf.mxu0 }
  0xbc   :  { %v358_v38 = vmax.f32 %v342_v35, 0.0  ;;  %v335_v40 = vadd.f32 %v727_v25, %v243_v36 }
  0xbe   :  { %v369_v39 = vpack.c.bf16 %v358_v38, %v357_v37  ;;  %v351_v43 = vmax.f32 %v335_v40, 0.0 }
  0xc0   :  { %465 = vmatmul.bf16.vlgmr.msra.gmra.mxu3 %v369_v39 }
  0xc1   :  { %v263_v41 = vpop.f32.mrf.mxu2 }
  0xc2   :  { %v343_v46 = vadd.f32 %v727_v25, %v263_v41 }
  0xc3   :  { %v245_v42 = vpop.f32.mrf.mxu0 }
  0xc4   :  { %v336_v44 = vadd.f32 %v727_v25, %v245_v42  ;;  %v359_v51 = vmax.f32 %v343_v46, 0.0 }
  0xc6   :  { %v352_v45 = vmax.f32 %v336_v44, 0.0 }
  0xc8   :  { %v366_v47 = vpack.c.bf16 %v352_v45, %v351_v43 }
  0xc9   :  { %v265_v48 = vpop.f32.mrf.mxu2 }
  0xca   :  { %v344_v49 = vadd.f32 %v727_v25, %v265_v48  ;;  %450 = vmatmul.bf16.gmra.mxu1 %v366_v47 }
  0xcb   :  { %v248_v50 = vpop.f32.mrf.mxu0 }
  0xcc   :  { %v360_v52 = vmax.f32 %v344_v49, 0.0  ;;  %v337_v54 = vadd.f32 %v727_v25, %v248_v50 }
  0xce   :  { %v370_v53 = vpack.c.bf16 %v360_v52, %v359_v51  ;;  %v353_v57 = vmax.f32 %v337_v54, 0.0 }
  0xd0   :  { %470 = vmatmul.bf16.gmra.mxu3 %v370_v53 }
  0xd1   :  { %v268_v55 = vpop.f32.mrf.mxu2 }
  0xd2   :  { %v345_v60 = vadd.f32 %v727_v25, %v268_v55 }
  0xd3   :  { %v250_v56 = vpop.f32.mrf.mxu0 }
  0xd4   :  { %v338_v58 = vadd.f32 %v727_v25, %v250_v56  ;;  %v361_v1 = vmax.f32 %v345_v60, 0.0 }
  0xd6   :  { %v354_v59 = vmax.f32 %v338_v58, 0.0 }
  0xd8   :  { %v367_v61 = vpack.c.bf16 %v354_v59, %v353_v57 }
  0xd9   :  { %v270_v62 = vpop.f32.mrf.mxu2 }
  0xda   :  { %v346_v63 = vadd.f32 %v727_v25, %v270_v62  ;;  %455 = vmatmul.bf16.gmra.mxu1 %v367_v61 }
  0xdb   :  { %v253_v0 = vpop.f32.mrf.mxu0 }
  0xdc   :  { %v362_v2 = vmax.f32 %v346_v63, 0.0  ;;  %v339_v4 = vadd.f32 %v727_v25, %v253_v0 }
  0xde   :  { %v371_v3 = vpack.c.bf16 %v362_v2, %v361_v1  ;;  %v355_v7 = vmax.f32 %v339_v4, 0.0 }
  0xe0   :  { %475 = vmatmul.bf16.gmra.mxu3 %v371_v3 }
  0xe1   :  { %v273_v5 = vpop.f32.mrf.mxu2 }
  0xe2   :  { %v347_v10 = vadd.f32 %v727_v25, %v273_v5 }
  0xe3   :  { %v255_v6 = vpop.f32.mrf.mxu0 }
  0xe4   :  { %v340_v8 = vadd.f32 %v727_v25, %v255_v6  ;;  %v363_v14 = vmax.f32 %v347_v10, 0.0 }
  0xe6   :  { %v356_v9 = vmax.f32 %v340_v8, 0.0 }
  0xe8   :  { %v368_v11 = vpack.c.bf16 %v356_v9, %v355_v7 }
  0xe9   :  { %v275_v12 = vpop.f32.mrf.mxu2 }
  0xea   :  { %v348_v13 = vadd.f32 %v727_v25, %v275_v12  ;;  %460 = vmatmul.bf16.gmra.mxu1 %v368_v11 }
  0xec   :  { %v364_v15 = vmax.f32 %v348_v13, 0.0 }
  0xee   :  { %v372_v16 = vpack.c.bf16 %v364_v15, %v363_v14 }
  0xf0   :  { %480 = vmatmul.bf16.gmra.mxu3 %v372_v16 }
 0x137   :  { %v446_v17 = vpop.f32.mrf.mxu1 }
 0x13f   :  { %v448_v18 = vpop.f32.mrf.mxu1 }
 0x140   :  { %v661_v19 = vpack.c.bf16 %v448_v18, %v446_v17 }
 0x142   :  { %662 = vst [vmem:[#allocation9] sm:$0xff] %v661_v19  }
 0x143   :  { %v466_v20 = vpop.f32.mrf.mxu3 }
 0x147   :  { %v451_v21 = vpop.f32.mrf.mxu1 }
 0x14b   :  { %v468_v22 = vpop.f32.mrf.mxu3 }
 0x14c   :  { %v681_v23 = vpack.c.bf16 %v468_v22, %v466_v20 }
 0x14e   :  { %701 = vst [vmem:[#allocation9 + $0x20] sm:$0xff] %v681_v23  }
 0x14f   :  { %v453_v24 = vpop.f32.mrf.mxu1 }
 0x150   :  { %v666_v26 = vpack.c.bf16 %v453_v24, %v451_v21 }
 0x152   :  { %698 = vst [vmem:[#allocation9 + $0x8] sm:$0xff] %v666_v26  }
 0x153   :  { %v471_v27 = vpop.f32.mrf.mxu3 }
 0x157   :  { %v456_v28 = vpop.f32.mrf.mxu1 }
 0x15b   :  { %v473_v25 = vpop.f32.mrf.mxu3 }
 0x15c   :  { %v686_v29 = vpack.c.bf16 %v473_v25, %v471_v27 }
 0x15e   :  { %702 = vst [vmem:[#allocation9 + $0x28] sm:$0xff] %v686_v29  }
 0x15f   :  { %v458_v30 = vpop.f32.mrf.mxu1 }
 0x160   :  { %v671_v31 = vpack.c.bf16 %v458_v30, %v456_v28 }
 0x162   :  { %699 = vst [vmem:[#allocation9 + $0x10] sm:$0xff] %v671_v31  }
 0x163   :  { %v476_v32 = vpop.f32.mrf.mxu3 }
 0x167   :  { %v461_v33 = vpop.f32.mrf.mxu1 }
 0x16b   :  { %v478_v34 = vpop.f32.mrf.mxu3 }
 0x16c   :  { %v691_v35 = vpack.c.bf16 %v478_v34, %v476_v32 }
 0x16e   :  { %703 = vst [vmem:[#allocation9 + $0x30] sm:$0xff] %v691_v35  }
 0x16f   :  { %v463_v36 = vpop.f32.mrf.mxu1 }
 0x170   :  { %v676_v37 = vpack.c.bf16 %v463_v36, %v461_v33 }
 0x172   :  { %700 = vst [vmem:[#allocation9 + $0x18] sm:$0xff] %v676_v37  }
 0x173   :  { %v481_v38 = vpop.f32.mrf.mxu3 }
 0x17b   :  { %v483_v39 = vpop.f32.mrf.mxu3 }
 0x17c   :  { %v696_v40 = vpack.c.bf16 %v483_v39, %v481_v38 }
 0x17e   :  { %704 = vst [vmem:[#allocation9 + $0x38] sm:$0xff] %v696_v40  }
 0x17f   :  { %530 = dma.vmem_to_hbm [thread:$0]  %s523_s5, 1024, %s525_s8, [#allocation5], %s831_s23, %s831_s23, %s832_s24  }
 0x180   :  { %828 = dma.done.wait [#allocation5], 1024  }
 0x181   :  { %829 = vsyncadd [#allocation5], 4294966272 }
 0x182   :  { %535 = vsyncpa [#allocation4], 1 }
 0x183   :  { %536 = vsyncpa [#allocation7], 1 }
 0x184   :  { %537 = vsyncpa [#allocation5], 1 }

</bundles_post_ra>
